<compile_context>
chip_gen: v6e
topology: v6e:2x2x1
jax: 0.10.0
libtpu: 0.0.40
codegen_flags: <defaults>
</compile_context>

<pallas_src>
import numpy as np
import jax
import jax.numpy as jnp
from jax.experimental import pallas as pl
from jax.experimental.pallas import tpu as pltpu

_PAD_COORD = 1.0e18  # padded data points are pushed "infinitely" far away


def _round_up(x, mult):
    return ((x + mult - 1) // mult) * mult


def _neighbor_kernel(r2_ref, q_ref, xt_ref, mask_ref, cnt_ref):
    """One (query-tile, data-tile) step.

    r2_ref   : SMEM f32[1]        -- radius squared
    q_ref    : VMEM f32[TM, d]    -- query tile
    xt_ref   : VMEM f32[d, TN]    -- data tile, transposed (lane-dense)
    mask_ref : VMEM i8 [TM, TN]   -- 1 iff ||q_i - x_j||^2 <= r^2
    cnt_ref  : VMEM i32[TM, 1]    -- neighbor count per query (accumulated over j)
    """
    j = pl.program_id(1)

    q = q_ref[...]                                   # [TM, d]
    xt = xt_ref[...]                                 # [d, TN]
    tm = q.shape[0]
    tn = xt.shape[1]
    d = q.shape[1]                                   # static (trace-time)

    # Direct per-coordinate squared-distance expansion (pure VPU work).
    d2 = jnp.zeros((tm, tn), jnp.float32)
    for k in range(d):
        diff = q[:, k:k + 1] - xt[k:k + 1, :]        # [TM, TN] via broadcast
        d2 = d2 + diff * diff

    within = d2 <= r2_ref[0]                         # VPU compare, no sqrt
    mask_ref[...] = within.astype(jnp.int8)

    @pl.when(j == 0)
    def _():
        cnt_ref[...] = jnp.zeros_like(cnt_ref)

    cnt_ref[...] += jnp.sum(within.astype(jnp.int32), axis=-1, keepdims=True)


def _neighbor_mask_and_counts(queries, data, radius):
    """Returns (int8 mask [m_p, n_p], int32 counts [m_p, 1]) on device.

    Inputs are padded to tile multiples; padded data points sit at a huge
    coordinate so they can never be neighbors, padded query rows are cropped
    by the caller.
    """
    m, d = queries.shape
    n, _ = data.shape

    # Tile sizes: TM multiple of 32 (int8 sublane packing), TN multiple of 128
    # (lane-dense mask stores).  Sized well below the 16 MiB scoped-VMEM
    # default of v5e and the 64 MiB physical VMEM of v7x.
    tm = min(128, _round_up(m, 32))
    tn = min(1024, _round_up(n, 128))
    m_p = _round_up(m, tm)
    n_p = _round_up(n, tn)

    q_pad = jnp.zeros((m_p, d), jnp.float32).at[:m].set(queries.astype(jnp.float32))
    x_pad = jnp.full((n_p, d), _PAD_COORD, jnp.float32).at[:n].set(
        data.astype(jnp.float32))
    xt = x_pad.T                                      # [d, n_p], one-time XLA transpose

    r2 = jnp.asarray([float(radius) * float(radius)], dtype=jnp.float32)

    grid = (m_p // tm, n_p // tn)

    mask, counts = pl.pallas_call(
        _neighbor_kernel,
        out_shape=(
            jax.ShapeDtypeStruct((m_p, n_p), jnp.int8),
            jax.ShapeDtypeStruct((m_p, 1), jnp.int32),
        ),
        grid=grid,
        in_specs=[
            pl.BlockSpec(memory_space=pltpu.MemorySpace.SMEM),     # r^2 scalar
            pl.BlockSpec((tm, d), lambda i, j: (i, 0)),            # query tile
            pl.BlockSpec((d, tn), lambda i, j: (0, j)),            # data tile (transposed)
        ],
        out_specs=(
            pl.BlockSpec((tm, tn), lambda i, j: (i, j)),           # mask tile
            pl.BlockSpec((tm, 1), lambda i, j: (i, 0)),            # resident count accumulator
        ),
        compiler_params=pltpu.CompilerParams(
            dimension_semantics=("parallel", "arbitrary")),
    )(r2, q_pad, xt)
    return mask, counts, m_p, n_p


class NeighborSearch:
    """JAX/Pallas port of neuralop NeighborSearch (simple_neighbor_search path)."""

    def __init__(self, use_open3d=False, use_torch_cluster=False):
        # Pallas implementation corresponds to the simple (brute-force) search.
        self.use_open3d = False

    def __call__(self, data, queries, radius):
        m = queries.shape[0]
        n = data.shape[0]

        mask, counts, _, _ = _neighbor_mask_and_counts(queries, data, radius)
        jax.block_until_ready((mask, counts))

        # TODO(synk): torch `.nonzero()` produces a dynamic-length tensor; no
        # static-shape Pallas equivalent, so CRS index extraction happens on
        # host from the (4x smaller) int8 mask.
        mask_np = np.asarray(mask)[:m, :n]            # crop padded rows/cols
        _, cols = np.nonzero(mask_np)                 # row-major -> query-ordered
        neighbors_index = cols.astype(np.int64)

        counts_np = np.asarray(counts)[:m, 0].astype(np.int64)
        row_splits = np.concatenate(
            [np.zeros((1,), np.int64), np.cumsum(counts_np)])

        return {
            "neighbors_index": neighbors_index,
            "neighbors_row_splits": row_splits,
        }


def _reference(data, queries, radius):
    """Plain-numpy reference matching simple_neighbor_search semantics."""
    q = np.asarray(queries, dtype=np.float64)
    x = np.asarray(data, dtype=np.float64)
    dists = np.sqrt(((q[:, None, :] - x[None, :, :]) ** 2).sum(-1))
    in_nbr = dists <= radius
    nbr_indices = np.nonzero(in_nbr)[1].astype(np.int64)
    splits = np.concatenate(
        [np.zeros((1,), np.int64), np.cumsum(in_nbr.sum(-1)).astype(np.int64)]
    )
    return nbr_indices, splits


if __name__ == "__main__":
    key = jax.random.PRNGKey(0)
    k_data, k_query = jax.random.split(key)

    n, m, d = 16, 8, 3          # data points, query points, coordinate dim
    radius = 0.5

    data = jax.random.uniform(k_data, (n, d), dtype=jnp.float32)
    queries = jax.random.uniform(k_query, (m, d), dtype=jnp.float32)

    search = NeighborSearch(use_open3d=False)
    out = search(data, queries, radius)

    ref_idx, ref_splits = _reference(data, queries, radius)
    assert out["neighbors_index"].dtype == np.int64
    assert out["neighbors_row_splits"].dtype == np.int64
    assert out["neighbors_row_splits"].shape == (m + 1,)
    np.testing.assert_array_equal(np.asarray(out["neighbors_index"]), ref_idx)
    np.testing.assert_array_equal(np.asarray(out["neighbors_row_splits"]), ref_splits)

    print("KERNEL_OK")
</pallas_src>

<mosaic_0001>
module attributes {stable_mosaic.version = 11 : i64} {
  func.func @_neighbor_kernel(%arg0: i32, %arg1: i32, %arg2: memref<1xf32, #tpu.memory_space<smem>>, %arg3: memref<32x3xf32, #tpu.memory_space<vmem>>, %arg4: memref<3x128xf32, #tpu.memory_space<vmem>>, %arg5: memref<32x128xi8, #tpu.memory_space<vmem>>, %arg6: memref<32x1xi32, #tpu.memory_space<vmem>>) attributes {dimension_semantics = [#tpu.dimension_semantics<parallel>, #tpu.dimension_semantics<arbitrary>], iteration_bounds = array<i64: 1, 1>, scalar_prefetch = 0 : i64, scratch_operands = 0 : i64, tpu.core_type = #tpu.core_type<tc>, window_params = [{transform_indices = @transform_0, window_bounds = array<i64: 1>}, {transform_indices = @transform_1, window_bounds = array<i64: 32, 3>}, {transform_indices = @transform_2, window_bounds = array<i64: 3, 128>}, {transform_indices = @transform_3, window_bounds = array<i64: 32, 128>}, {transform_indices = @transform_4, window_bounds = array<i64: 32, 1>}]} {
    %c0 = arith.constant 0 : index
    %c0_0 = arith.constant 0 : index
    %0 = vector.load %arg3[%c0, %c0_0] : memref<32x3xf32, #tpu.memory_space<vmem>>, vector<32x3xf32>
    %c0_1 = arith.constant 0 : index
    %c0_2 = arith.constant 0 : index
    %1 = vector.load %arg4[%c0_1, %c0_2] : memref<3x128xf32, #tpu.memory_space<vmem>>, vector<3x128xf32>
    %cst = arith.constant 0.000000e+00 : f32
    %2 = vector.broadcast %cst : f32 to vector<32x128xf32>
    %3 = vector.extract_strided_slice %0 {offsets = [0, 0], sizes = [32, 1], strides = [1, 1]} : vector<32x3xf32> to vector<32x1xf32>
    %4 = vector.extract_strided_slice %1 {offsets = [0, 0], sizes = [1, 128], strides = [1, 1]} : vector<3x128xf32> to vector<1x128xf32>
    %5 = vector.broadcast %3 : vector<32x1xf32> to vector<32x128xf32>
    %6 = vector.broadcast %4 : vector<1x128xf32> to vector<32x128xf32>
    %7 = arith.subf %5, %6 : vector<32x128xf32>
    %8 = arith.mulf %7, %7 : vector<32x128xf32>
    %9 = arith.addf %2, %8 : vector<32x128xf32>
    %10 = vector.extract_strided_slice %0 {offsets = [0, 1], sizes = [32, 1], strides = [1, 1]} : vector<32x3xf32> to vector<32x1xf32>
    %11 = vector.extract_strided_slice %1 {offsets = [1, 0], sizes = [1, 128], strides = [1, 1]} : vector<3x128xf32> to vector<1x128xf32>
    %12 = vector.broadcast %10 : vector<32x1xf32> to vector<32x128xf32>
    %13 = vector.broadcast %11 : vector<1x128xf32> to vector<32x128xf32>
    %14 = arith.subf %12, %13 : vector<32x128xf32>
    %15 = arith.mulf %14, %14 : vector<32x128xf32>
    %16 = arith.addf %9, %15 : vector<32x128xf32>
    %17 = vector.extract_strided_slice %0 {offsets = [0, 2], sizes = [32, 1], strides = [1, 1]} : vector<32x3xf32> to vector<32x1xf32>
    %18 = vector.extract_strided_slice %1 {offsets = [2, 0], sizes = [1, 128], strides = [1, 1]} : vector<3x128xf32> to vector<1x128xf32>
    %19 = vector.broadcast %17 : vector<32x1xf32> to vector<32x128xf32>
    %20 = vector.broadcast %18 : vector<1x128xf32> to vector<32x128xf32>
    %21 = arith.subf %19, %20 : vector<32x128xf32>
    %22 = arith.mulf %21, %21 : vector<32x128xf32>
    %23 = arith.addf %16, %22 : vector<32x128xf32>
    %c0_3 = arith.constant 0 : index
    %24 = memref.load %arg2[%c0_3] : memref<1xf32, #tpu.memory_space<smem>>
    %25 = vector.broadcast %24 : f32 to vector<32x128xf32>
    %26 = arith.cmpf ole, %23, %25 : vector<32x128xf32>
    %27 = arith.extui %26 : vector<32x128xi1> to vector<32x128xi8>
    %c0_4 = arith.constant 0 : index
    %c0_5 = arith.constant 0 : index
    %28 = vector.load %arg5[%c0_4, %c0_5] : memref<32x128xi8, #tpu.memory_space<vmem>>, vector<32x128xi8>
    tpu.vector_store %arg5[%c0_4, %c0_5], %27 {strides = array<i32>} : memref<32x128xi8, #tpu.memory_space<vmem>>, vector<32x128xi8>,
    %c0_i32 = arith.constant 0 : i32
    %29 = arith.cmpi eq, %arg1, %c0_i32 : i32
    %30 = arith.extui %29 : i1 to i32
    %c0_i32_6 = arith.constant 0 : i32
    %31 = arith.cmpi ne, %30, %c0_i32_6 : i32
    scf.if %31 {
      %c0_i32_12 = arith.constant 0 : i32
      %38 = vector.broadcast %c0_i32_12 : i32 to vector<32x1xi32>
      %c0_13 = arith.constant 0 : index
      %c0_14 = arith.constant 0 : index
      %39 = vector.load %arg6[%c0_13, %c0_14] : memref<32x1xi32, #tpu.memory_space<vmem>>, vector<32x1xi32>
      tpu.vector_store %arg6[%c0_13, %c0_14], %38 {strides = array<i32>} : memref<32x1xi32, #tpu.memory_space<vmem>>, vector<32x1xi32>,
    } else {
    }
    %c0_7 = arith.constant 0 : index
    %c0_8 = arith.constant 0 : index
    %32 = vector.load %arg6[%c0_7, %c0_8] : memref<32x1xi32, #tpu.memory_space<vmem>>, vector<32x1xi32>
    %33 = arith.extui %26 : vector<32x128xi1> to vector<32x128xi32>
    %cst_9 = arith.constant dense<0> : vector<32xi32>
    %34 = vector.multi_reduction <add>, %33, %cst_9 [1] : vector<32x128xi32> to vector<32xi32>
    %35 = vector.shape_cast %34 : vector<32xi32> to vector<32x1xi32>
    %36 = arith.addi %32, %35 : vector<32x1xi32>
    %c0_10 = arith.constant 0 : index
    %c0_11 = arith.constant 0 : index
    %37 = vector.load %arg6[%c0_10, %c0_11] : memref<32x1xi32, #tpu.memory_space<vmem>>, vector<32x1xi32>
    tpu.vector_store %arg6[%c0_10, %c0_11], %36 {strides = array<i32>} : memref<32x1xi32, #tpu.memory_space<vmem>>, vector<32x1xi32>,
    return
  }
  func.func @transform_0(%arg0: i32, %arg1: i32) -> i32 {
    %c0_i32 = arith.constant 0 : i32
    %c0_i32_0 = arith.constant 0 : i32
    return %c0_i32 : i32
  }
  func.func @transform_1(%arg0: i32, %arg1: i32) -> (i32, i32) {
    %c0_i32 = arith.constant 0 : i32
    %c0_i32_0 = arith.constant 0 : i32
    return %arg0, %c0_i32 : i32, i32
  }
  func.func @transform_2(%arg0: i32, %arg1: i32) -> (i32, i32) {
    %c0_i32 = arith.constant 0 : i32
    %c0_i32_0 = arith.constant 0 : i32
    return %c0_i32, %arg1 : i32, i32
  }
  func.func @transform_3(%arg0: i32, %arg1: i32) -> (i32, i32) {
    %c0_i32 = arith.constant 0 : i32
    return %arg0, %arg1 : i32, i32
  }
  func.func @transform_4(%arg0: i32, %arg1: i32) -> (i32, i32) {
    %c0_i32 = arith.constant 0 : i32
    %c0_i32_0 = arith.constant 0 : i32
    return %arg0, %c0_i32 : i32, i32
  }
}

</mosaic_0001>

<bundles_post_ra>
// kernel: tpu_custom_call.1
= control target key start
LH: loop header
LB: loop body
LE: loop exit
PB: predicated region body
PF: predicated region fallthrough
CT: control target
= control target key end

     0   :  { %v260_v2 = vmov 0   ;;  %s369_s0 = inlined_call_operand.<no memory space> [shape: f32[1], index: 0, kind: input, shape index: {}]   ;;  %s370_s1 = inlined_call_operand.vmem [shape: f32[32,3], index: 1, kind: input, shape index: {}]   ;;  %s371_s2 = inlined_call_operand.vmem [shape: f32[3,128], index: 2, kind: input, shape index: {}]   ;;  %s372_s3 = inlined_call_operand.hbm [shape: s8[32,128], index: 3, kind: output, shape index: {0}]   ;;  %s373_s4 = inlined_call_operand.vmem [shape: s32[32,1], index: 4, kind: output, shape index: {1}]  }
   0x1   :  { %v22_v0 = vld [vmem:[%s370_s1 + $0x10] sm:$0xff]  ;;  %v20_v1 = vld [vmem:[%s370_s1] sm:$0xff]  ;;  %233 = vset.pattern.permute.xlu1 %v260_v2  ;;  %232 = vset.pattern.permute.xlu0 %v260_v2 }
   0x2   :  { %11 = vsyncpa [#allocation4], 0  ;;  %37 = vperm.xlu1 %233, %v22_v0   ;;  %27 = vperm.xlu0 %232, %v20_v1   ;;  %v23_v3 = vld [vmem:[%s370_s1 + $0x18] sm:$0xff]  ;;  %v21_v4 = vld [vmem:[%s370_s1 + $0x8] sm:$0xff]  ;;  %v261_v5 = vmov 1   ;;  %v262_v6 = vmov 2   ;;  %v45_v7 = vlaneseq  ;;  %v126_v46 = vstv %s369_s0 }
   0x3   :  { %v24_v14 = vld [vmem:[%s371_s2] sm:$0x7]  ;;  %vm140_vm7 = vcmask 7168   ;;  %s263_s6 = smov [#allocation3]  }
   0x4   :  { %v46_v10 = vshrl.u32 %v45_v7, 7  ;;  %141 = vst.msk [vmem:[%s373_s4] sm:$0xff] %vm140_vm7, %v260_v2  ;;  %142 = vst.msk [vmem:[%s373_s4 + $0x8] sm:$0xff] %vm140_vm7, %v260_v2  ;;  %s216_s7 = sshll.u32 %s263_s6, 4  ;;  %s217_s7 = int_to_ptr.vmem [resolvable:$true] %s216_s7 }
   0x5   :  { %143 = vst.msk [vmem:[%s373_s4 + $0x10] sm:$0xff] %vm140_vm7, %v260_v2  ;;  %144 = vst.msk [vmem:[%s373_s4 + $0x18] sm:$0xff] %vm140_vm7, %v260_v2  ;;  %s238_s8 = scalar_lea.vmem %s217_s7, 128  ;;  %p243_p1 = scmp.lt.s32.totalorder %s217_s7, %s217_s7 }
   0x6   :  { %42 = vperm.xlu1 %233, %v23_v3   ;;  %32 = vperm.xlu0 %232, %v21_v4   ;;  %v79_v13 = vsub.s32 1, %v46_v10  ;;  %v47_v15 = vsub.s32 0, %v46_v10  ;;  %v111_v19 = vsub.s32 2, %v46_v10  ;;  %p239_p0 = scmp.ne.s32.totalorder %s217_s7, %s238_s8  ;;  %p244_p2 = scmp.lt.s32.totalorder %s238_s8, %s238_s8 }
   0x8   :  { %v80_v16 = vrot.slane %v24_v14, %v79_v13  ;;  %v48_v20 = vrot.slane %v24_v14, %v47_v15  ;;  %v112_v27 = vrot.slane %v24_v14, %v111_v19  ;;  %p245_p3 = por %p244_p2, %p243_p1 }
   0xa   :  { %235 = vset.pattern.permute.xlu1 %v261_v5  ;;  %234 = vset.pattern.permute.xlu0 %v261_v5  ;;  %p246_p4 = pnand %p245_p3, %p239_p0 }
   0xb   :  { %66 = vperm.xlu1 %235, %v21_v4   ;;  %62 = vperm.xlu0 %234, %v20_v1  }
   0xf   :  { %70 = vperm.xlu1 %235, %v22_v0   ;;  %74 = vperm.xlu0 %234, %v23_v3  }
  0x13   :  { %236 = vset.pattern.permute.xlu1 %v262_v6  ;;  %237 = vset.pattern.permute.xlu0 %v262_v6 }
  0x14   :  { %94 = vperm.xlu1 %236, %v20_v1   ;;  %98 = vperm.xlu0 %237, %v21_v4  }
  0x18   :  { %102 = vperm.xlu1 %236, %v22_v0  }
  0x1c   :  { %106 = vperm.xlu1 %236, %v23_v3  }
  0x7d   :  { %v38_v8 = vpop.permute.xlu1 %37  ;;  %v28_v9 = vpop.permute.xlu0 %27 }
  0x7e   :  { %v49_v26 = vsub.f32 %v28_v9, %v48_v20  ;;  %v51_v34 = vsub.f32 %v38_v8, %v48_v20 }
  0x80   :  { %v53_v35 = vmul.f32 %v49_v26, %v49_v26  ;;  %v55_v47 = vmul.f32 %v51_v34, %v51_v34 }
  0x81   :  { %v43_v11 = vpop.permute.xlu1 %42  ;;  %v33_v12 = vpop.permute.xlu0 %32 }
  0x82   :  { %v50_v25 = vsub.f32 %v33_v12, %v48_v20  ;;  %v52_v44 = vsub.f32 %v43_v11, %v48_v20 }
  0x84   :  { %v54_v31 = vmul.f32 %v50_v25, %v50_v25  ;;  %v56_v54 = vmul.f32 %v52_v44, %v52_v44 }
  0x86   :  { %v67_v17 = vpop.permute.xlu1 %66  ;;  %v63_v18 = vpop.permute.xlu0 %62 }
  0x87   :  { %v82_v21 = vsub.f32 %v67_v17, %v80_v16  ;;  %v81_v22 = vsub.f32 %v63_v18, %v80_v16 }
  0x89   :  { %v86_v28 = vmul.f32 %v82_v21, %v82_v21  ;;  %v85_v29 = vmul.f32 %v81_v22, %v81_v22 }
  0x8a   :  { %v71_v23 = vpop.permute.xlu1 %70  ;;  %v75_v24 = vpop.permute.xlu0 %74 }
  0x8b   :  { %v83_v30 = vsub.f32 %v71_v23, %v80_v16  ;;  %v90_v38 = vadd.f32 %v86_v28, %v54_v31  ;;  %v84_v39 = vsub.f32 %v75_v24, %v80_v16  ;;  %v89_v40 = vadd.f32 %v85_v29, %v53_v35 }
  0x8d   :  { %v87_v41 = vmul.f32 %v83_v30, %v83_v30  ;;  %v88_v51 = vmul.f32 %v84_v39, %v84_v39 }
  0x8f   :  { %v95_v32 = vpop.permute.xlu1 %94  ;;  %v99_v33 = vpop.permute.xlu0 %98  ;;  %v91_v52 = vadd.f32 %v87_v41, %v55_v47  ;;  %v92_v62 = vadd.f32 %v88_v51, %v56_v54 }
  0x90   :  { %v113_v36 = vsub.f32 %v95_v32, %v112_v27  ;;  %v114_v37 = vsub.f32 %v99_v33, %v112_v27 }
  0x92   :  { %v117_v42 = vmul.f32 %v113_v36, %v113_v36  ;;  %v118_v43 = vmul.f32 %v114_v37, %v114_v37 }
  0x93   :  { %v103_v45 = vpop.permute.xlu1 %102 }
  0x94   :  { %v121_v48 = vadd.f32 %v117_v42, %v89_v40  ;;  %v122_v49 = vadd.f32 %v118_v43, %v90_v38  ;;  %v115_v50 = vsub.f32 %v103_v45, %v112_v27 }
  0x96   :  { %v119_v53 = vmul.f32 %v115_v50, %v115_v50  ;;  %vm127_vm0 = vcmp.le.f32.partialorder %v121_v48, %v126_v46  ;;  %vm128_vm1 = vcmp.le.f32.partialorder %v122_v49, %v126_v46 }
  0x97   :  { %v107_v55 = vpop.permute.xlu1 %106  ;;  %v149_v56 = vsel %vm127_vm0, 1, %v260_v2  ;;  %v150_v57 = vsel %vm128_vm1, 1, %v260_v2  ;;  %vm131_vm4 = vmpackc.low %vm128_vm1, %vm127_vm0 }
  0x98   :  { %v123_v58 = vadd.f32 %v119_v53, %v91_v52  ;;  %v116_v59 = vsub.f32 %v107_v55, %v112_v27  ;;  %v154_v60 = vshrl.u32 %v149_v56, 16  ;;  %v166_v61 = vshrl.u32 %v150_v57, 16 }
  0x99   :  { %v153_v63 = vand.u32 65535, %v149_v56  ;;  %v165_v15 = vand.u32 65535, %v150_v57 }
  0x9a   :  { %v120_v0 = vmul.f32 %v116_v59, %v116_v59  ;;  %v156_v1 = vcvt.s32.f32 %v154_v60  ;;  %v168_v3 = vcvt.s32.f32 %v166_v61  ;;  %vm129_vm2 = vcmp.le.f32.partialorder %v123_v58, %v126_v46 }
  0x9b   :  { %v151_v4 = vsel %vm129_vm2, 1, %v260_v2  ;;  %v155_v8 = vcvt.s32.f32 %v153_v63  ;;  %v167_v16 = vcvt.s32.f32 %v165_v15 }
  0x9c   :  { %v124_v5 = vadd.f32 %v120_v0, %v92_v62  ;;  %159 = vadd.xlane.f32.xlu0 %v156_v1  ;;  %171 = vadd.xlane.f32.xlu1 %v168_v3  ;;  %v178_v6 = vshrl.u32 %v151_v4, 16  ;;  %v177_v9 = vand.u32 65535, %v151_v4 }
  0x9e   :  { %v180_v7 = vcvt.s32.f32 %v178_v6  ;;  %vm130_vm3 = vcmp.le.f32.partialorder %v124_v5, %v126_v46  ;;  %v179_v14 = vcvt.s32.f32 %v177_v9 }
  0x9f   :  { %v152_v10 = vsel %vm130_vm3, 1, %v260_v2  ;;  %vm132_vm5 = vmpackc.low %vm130_vm3, %vm129_vm2 }
  0xa0   :  { %183 = vadd.xlane.f32.xlu0 %v180_v7  ;;  %157 = vadd.xlane.f32.xlu1 %v155_v8  ;;  %v190_v11 = vshrl.u32 %v152_v10, 16  ;;  %vm133_vm6 = vmpackc.even %vm132_vm5, %vm131_vm4  ;;  %v189_v17 = vand.u32 65535, %v152_v10 }
  0xa1   :  { %v134_v12 = vsel %vm133_vm6, 16843009, %v260_v2 }
  0xa2   :  { %v192_v13 = vcvt.s32.f32 %v190_v11  ;;  %135 = vst [vmem:[#allocation3] sm:$0xff] %v134_v12  ;;  %v191_v18 = vcvt.s32.f32 %v189_v17 }
  0xa4   :  { %195 = vadd.xlane.f32.xlu0 %v192_v13  ;;  %181 = vadd.xlane.f32.xlu1 %v179_v14 }
  0xa8   :  { %169 = vadd.xlane.f32.xlu0 %v167_v16 }
  0xac   :  { %193 = vadd.xlane.f32.xlu0 %v191_v18 }
  0xad   :  { %249 = shalt.err (!%p246_p4)
}
  0xae   :  { %219 = dma.vmem_to_hbm [thread:$0]  %s217_s7, 128, %s372_s3, [#allocation4]   ;;  %v145_v26 = vld [vmem:[%s373_s4] sm:$0xff]  ;;  %v147_v34 = vld [vmem:[%s373_s4 + $0x10] sm:$0xff]  ;;  %v146_v41 = vld [vmem:[%s373_s4 + $0x8] sm:$0xff] }
  0xaf   :  { %v148_v47 = vld [vmem:[%s373_s4 + $0x18] sm:$0xff] }
 0x125   :  { %v172_v19 = vpop.xlane.xlu1 %171  ;;  %v160_v20 = vpop.xlane.xlu0 %159 }
 0x126   :  { %v162_v2 = vcvt.f32.s32 %v160_v20  ;;  %v174_v30 = vcvt.f32.s32 %v172_v19 }
 0x128   :  { %v163_v23 = vshll.u32 %v162_v2, 16  ;;  %v175_v37 = vshll.u32 %v174_v30, 16 }
 0x129   :  { %v158_v21 = vpop.xlane.xlu1 %157  ;;  %v184_v22 = vpop.xlane.xlu0 %183 }
 0x12a   :  { %v161_v24 = vcvt.f32.s32 %v158_v21  ;;  %v186_v25 = vcvt.f32.s32 %v184_v22 }
 0x12c   :  { %v164_v27 = vadd.s32 %v163_v23, %v161_v24  ;;  %v187_v32 = vshll.u32 %v186_v25, 16 }
 0x12d   :  { %v182_v28 = vpop.xlane.xlu1 %181  ;;  %v196_v29 = vpop.xlane.xlu0 %195 }
 0x12e   :  { %v201_v31 = vadd.s32 %v164_v27, %v145_v26  ;;  %v185_v33 = vcvt.f32.s32 %v182_v28  ;;  %v198_v39 = vcvt.f32.s32 %v196_v29 }
 0x130   :  { %206 = vst.msk [vmem:[%s373_s4] sm:$0xff] %vm140_vm7, %v201_v31  ;;  %v188_v35 = vadd.s32 %v187_v32, %v185_v33  ;;  %v199_v44 = vshll.u32 %v198_v39, 16 }
 0x131   :  { %v170_v36 = vpop.xlane.xlu0 %169 }
 0x132   :  { %v203_v38 = vadd.s32 %v188_v35, %v147_v34  ;;  %v173_v40 = vcvt.f32.s32 %v170_v36 }
 0x134   :  { %208 = vst.msk [vmem:[%s373_s4 + $0x10] sm:$0xff] %vm140_vm7, %v203_v38  ;;  %v176_v42 = vadd.s32 %v175_v37, %v173_v40 }
 0x135   :  { %v194_v43 = vpop.xlane.xlu0 %193 }
 0x136   :  { %v202_v45 = vadd.s32 %v176_v42, %v146_v41  ;;  %v197_v46 = vcvt.f32.s32 %v194_v43 }
 0x138   :  { %207 = vst.msk [vmem:[%s373_s4 + $0x8] sm:$0xff] %vm140_vm7, %v202_v45  ;;  %v200_v48 = vadd.s32 %v199_v44, %v197_v46 }
 0x13a   :  { %v204_v49 = vadd.s32 %v200_v48, %v148_v47 }
 0x13c   :  { %209 = vst.msk [vmem:[%s373_s4 + $0x18] sm:$0xff] %vm140_vm7, %v204_v49 }
 0x13d   :  { %258 = dma.done.wait [#allocation4], 128  }
 0x13e   :  { %259 = vsyncadd [#allocation4], 4294967168 }
 0x13f   :  { %227 = vsyncpa [#allocation4], 1 }

</bundles_post_ra>
